<compile_context>
chip_gen: v5e
topology: v5e:2x2
jax: 0.10.0
libtpu: 0.0.40
codegen_flags: <defaults>
</compile_context>

<pallas_src>
import functools

import jax
import jax.numpy as jnp
from jax.experimental import pallas as pl
from jax.experimental.pallas import tpu as pltpu


def _svdd_kernel(x_ref, w1_ref, w2_ref, w3_ref, w4_ref, b4_ref, w5_ref, b5_ref,
                 z_ref, xhat_ref):
    x = x_ref[...].astype(w1_ref.dtype)

    # --- SVM1: Linear -> ReLU -> Linear -> ReLU -> Linear (all bias-free) ---
    h = jnp.dot(x, w1_ref[...], preferred_element_type=jnp.float32)
    h = jnp.maximum(h, 0.0).astype(w2_ref.dtype)
    h = jnp.dot(h, w2_ref[...], preferred_element_type=jnp.float32)
    h = jnp.maximum(h, 0.0).astype(w3_ref.dtype)
    z = jnp.dot(h, w3_ref[...], preferred_element_type=jnp.float32)
    z_ref[...] = z.astype(z_ref.dtype)

    # --- decoder_pretrain: ReLU -> Linear(+b) -> ReLU -> Linear(+b) ---
    d = jnp.maximum(z, 0.0).astype(w4_ref.dtype)
    d = jnp.dot(d, w4_ref[...], preferred_element_type=jnp.float32)
    d = d + b4_ref[...].astype(jnp.float32)
    d = jnp.maximum(d, 0.0).astype(w5_ref.dtype)
    xhat = jnp.dot(d, w5_ref[...], preferred_element_type=jnp.float32)
    xhat = xhat + b5_ref[...].astype(jnp.float32)
    xhat_ref[...] = xhat.astype(xhat_ref.dtype)


def _round_up(v, m):
    return ((v + m - 1) // m) * m


def _round_down(v, m):
    return (v // m) * m


def _pad2(a, rows, cols):
    pr, pc = rows - a.shape[0], cols - a.shape[1]
    if pr == 0 and pc == 0:
        return a
    return jnp.pad(a, ((0, pr), (0, pc)))


def _vmem_capacity_bytes():
    try:
        return int(pltpu.get_tpu_info().vmem_capacity_bytes)
    except Exception:
        return 64 << 20  # conservative (v7x-sized) fallback


@functools.partial(jax.jit, static_argnames=("batch_tile", "weight_dtype"))
def svdd_forward(x, params, *, batch_tile=None, weight_dtype=None):
    """Fused SVDD forward. x: (B, input_dim). Returns (z1, xhat)."""
    w1t, w2t, w3t, w4t, b4, w5t, b5 = params
    B, input_dim = x.shape
    hidden_dim = w1t.shape[1]
    z_dim = w3t.shape[1]
    assert z_dim == hidden_dim, "decoder_pretrain requires z_dim == hidden_dim"

    if weight_dtype is not None:
        # Opt-in reduced-precision resident weights (e.g. jnp.bfloat16): halves VMEM
        # footprint and uses the MXU native rate; accumulation stays f32 in-kernel.
        w1t, w2t, w3t, w4t, w5t = (a.astype(weight_dtype)
                                   for a in (w1t, w2t, w3t, w4t, w5t))
        # TODO(synk): optional fp8 weight path (per-column scales) for v7x inference.

    # ---- pad ONLY the internal hidden dim (lane-dense intermediates); exact zero-padding ----
    # x's feature dim, z1's dim and xhat's dim stay unpadded -> no activation copies in HBM.
    h_p = _round_up(hidden_dim, 128)
    w1p = _pad2(w1t, input_dim, h_p)         # (din, h_p)
    w2p = _pad2(w2t, h_p, h_p)               # (h_p, h_p)
    w3p = _pad2(w3t, h_p, z_dim)             # (h_p, z)
    w4p = _pad2(w4t, z_dim, h_p)             # (z, h_p)
    b4p = _pad2(b4.reshape(1, -1), 1, h_p)   # (1, h_p)
    w5p = _pad2(w5t, h_p, input_dim)         # (h_p, din)
    b5p = b5.reshape(1, -1)                  # (1, din)
    weights = (w1p, w2p, w3p, w4p, b4p, w5p, b5p)

    act_dtype = jnp.dtype(x.dtype)
    sublane = 8 if act_dtype.itemsize >= 4 else 16

    # ---- VMEM accounting that matches actual allocation ----
    vmem_cap = _vmem_capacity_bytes()
    vmem_budget = (vmem_cap * 13) // 16                 # ~81%: headroom for Mosaic scratch/spill
    weight_bytes = sum(int(a.size) * jnp.dtype(a.dtype).itemsize for a in weights)  # x1 (Buffered(1))
    internal = 8 << 20                                  # compiler-internal scratch headroom
    io_row = 2 * (2 * input_dim + z_dim) * act_dtype.itemsize   # double-buffered x/z/xhat rows
    f32_row = (3 * h_p + z_dim + input_dim) * 4                 # live f32 intermediates per row
    per_row = io_row + f32_row

    # ---- batch tile: as big as fits the budget, but keep >=2 grid steps (megacore) ----
    fit_rows = max(sublane, (vmem_budget - weight_bytes - internal) // max(per_row, 1))
    if batch_tile is None:
        batch_tile = min(2048, fit_rows)
    tb = max(sublane, _round_down(int(min(batch_tile, fit_rows)), sublane))
    tb = min(tb, _round_up(pl.cdiv(B, 2), sublane))     # >=2 tiles whenever B allows
    tb = max(tb, sublane)
    n_tiles = pl.cdiv(B, tb)                            # partial last tile: masked reads/writes

    need = weight_bytes + tb * per_row + internal
    vmem_limit = int(min(max(need, 32 << 20), vmem_budget))

    flops = 2 * B * (input_dim * h_p + h_p * h_p + h_p * z_dim
                     + z_dim * h_p + h_p * input_dim)
    bytes_accessed = weight_bytes + B * (2 * input_dim + z_dim) * act_dtype.itemsize

    def resident(a):
        # Weights/biases: constant block, single-buffered (no double-buffer waste).
        return pl.BlockSpec(a.shape, lambda i: (0,) * a.ndim,
                            pipeline_mode=pl.Buffered(1))

    z1, xhat = pl.pallas_call(
        _svdd_kernel,
        out_shape=(
            jax.ShapeDtypeStruct((B, z_dim), act_dtype),
            jax.ShapeDtypeStruct((B, input_dim), act_dtype),
        ),
        grid_spec=pltpu.PrefetchScalarGridSpec(
            num_scalar_prefetch=0,
            grid=(n_tiles,),
            in_specs=[pl.BlockSpec((tb, input_dim), lambda i: (i, 0))]
                     + [resident(a) for a in weights],
            out_specs=[
                pl.BlockSpec((tb, z_dim), lambda i: (i, 0)),
                pl.BlockSpec((tb, input_dim), lambda i: (i, 0)),
            ],
        ),
        compiler_params=pltpu.CompilerParams(
            dimension_semantics=("parallel",),
            vmem_limit_bytes=vmem_limit,
        ),
        cost_estimate=pl.CostEstimate(
            flops=flops, transcendentals=0, bytes_accessed=bytes_accessed),
    )(x, *weights)

    return z1, xhat


def init_params(key, input_dim, hidden_dim, z_dim, dtype=jnp.float32):
    """PyTorch-default-like init: U(-1/sqrt(fan_in), 1/sqrt(fan_in)).
    Weights stored pre-transposed as (in_features, out_features)."""
    ks = jax.random.split(key, 7)

    def lin_w(k, fan_in, fan_out):
        bound = 1.0 / jnp.sqrt(fan_in)
        return jax.random.uniform(k, (fan_in, fan_out), dtype, -bound, bound)

    def lin_b(k, fan_in, fan_out):
        bound = 1.0 / jnp.sqrt(fan_in)
        return jax.random.uniform(k, (fan_out,), dtype, -bound, bound)

    w1t = lin_w(ks[0], input_dim, hidden_dim)   # SVM1 Linear 1 (no bias)
    w2t = lin_w(ks[1], hidden_dim, hidden_dim)  # SVM1 Linear 2 (no bias)
    w3t = lin_w(ks[2], hidden_dim, z_dim)       # SVM1 Linear 3 (no bias)
    w4t = lin_w(ks[3], hidden_dim, hidden_dim)  # decoder Linear 1
    b4 = lin_b(ks[4], hidden_dim, hidden_dim)
    w5t = lin_w(ks[5], hidden_dim, input_dim)   # decoder Linear 2
    b5 = lin_b(ks[6], hidden_dim, input_dim)
    return (w1t, w2t, w3t, w4t, b4, w5t, b5)


def svdd_reference(x, params):
    """Pure-JAX reference for correctness checking."""
    w1t, w2t, w3t, w4t, b4, w5t, b5 = params
    h = jnp.maximum(x @ w1t, 0.0)
    h = jnp.maximum(h @ w2t, 0.0)
    z = h @ w3t
    d = jnp.maximum(z, 0.0)
    d = jnp.maximum(d @ w4t + b4, 0.0)
    xhat = d @ w5t + b5
    return z, xhat


if __name__ == "__main__":
    # Small shapes consistent with the module; z_dim must equal hidden_dim for
    # decoder_pretrain(z1) to be well-formed.
    # TODO(synk): init_c / distance / R1 / c1 are host-side training state, not part of forward.
    batch, input_dim, hidden_dim = 8, 16, 32
    z_dim = hidden_dim

    key = jax.random.PRNGKey(0)
    kx, kp = jax.random.split(key)
    x = jax.random.normal(kx, (batch, input_dim), jnp.float32)
    params = init_params(kp, input_dim, hidden_dim, z_dim)

    z1, xhat = jax.block_until_ready(svdd_forward(x, params))
    z1_ref, xhat_ref = svdd_reference(x, params)
    assert z1.shape == (batch, z_dim) and xhat.shape == (batch, input_dim)
    assert jnp.allclose(z1, z1_ref, atol=1e-5, rtol=1e-5)
    assert jnp.allclose(xhat, xhat_ref, atol=1e-5, rtol=1e-5)

    # Exercise the un-padded batch path (partial last tile handled by block masking).
    x2 = jax.random.normal(kx, (13, input_dim), jnp.float32)
    z1b, xhatb = jax.block_until_ready(svdd_forward(x2, params))
    z1b_ref, xhatb_ref = svdd_reference(x2, params)
    assert jnp.allclose(z1b, z1b_ref, atol=1e-5, rtol=1e-5)
    assert jnp.allclose(xhatb, xhatb_ref, atol=1e-5, rtol=1e-5)

    print("KERNEL_OK")
</pallas_src>

<mosaic_0001>
module attributes {stable_mosaic.version = 11 : i64} {
  func.func @_svdd_kernel(%arg0: i32, %arg1: memref<8x16xf32, #tpu.memory_space<vmem>>, %arg2: memref<16x128xf32, #tpu.memory_space<vmem>>, %arg3: memref<128x128xf32, #tpu.memory_space<vmem>>, %arg4: memref<128x32xf32, #tpu.memory_space<vmem>>, %arg5: memref<32x128xf32, #tpu.memory_space<vmem>>, %arg6: memref<1x128xf32, #tpu.memory_space<vmem>>, %arg7: memref<128x16xf32, #tpu.memory_space<vmem>>, %arg8: memref<1x16xf32, #tpu.memory_space<vmem>>, %arg9: memref<8x32xf32, #tpu.memory_space<vmem>>, %arg10: memref<8x16xf32, #tpu.memory_space<vmem>>) attributes {dimension_semantics = [#tpu.dimension_semantics<parallel>], iteration_bounds = array<i64: 1>, scalar_prefetch = 0 : i64, scratch_operands = 0 : i64, tpu.core_type = #tpu.core_type<tc>, window_params = [{transform_indices = @transform_0, window_bounds = array<i64: 8, 16>}, {pipeline_mode = #tpu.pipeline_mode<synchronous>, transform_indices = @transform_1, window_bounds = array<i64: 16, 128>}, {pipeline_mode = #tpu.pipeline_mode<synchronous>, transform_indices = @transform_2, window_bounds = array<i64: 128, 128>}, {pipeline_mode = #tpu.pipeline_mode<synchronous>, transform_indices = @transform_3, window_bounds = array<i64: 128, 32>}, {pipeline_mode = #tpu.pipeline_mode<synchronous>, transform_indices = @transform_4, window_bounds = array<i64: 32, 128>}, {pipeline_mode = #tpu.pipeline_mode<synchronous>, transform_indices = @transform_5, window_bounds = array<i64: 1, 128>}, {pipeline_mode = #tpu.pipeline_mode<synchronous>, transform_indices = @transform_6, window_bounds = array<i64: 128, 16>}, {pipeline_mode = #tpu.pipeline_mode<synchronous>, transform_indices = @transform_7, window_bounds = array<i64: 1, 16>}, {transform_indices = @transform_8, window_bounds = array<i64: 8, 32>}, {transform_indices = @transform_9, window_bounds = array<i64: 8, 16>}]} {
    %c0 = arith.constant 0 : index
    %c0_0 = arith.constant 0 : index
    %0 = vector.load %arg1[%c0, %c0_0] : memref<8x16xf32, #tpu.memory_space<vmem>>, vector<8x16xf32>
    %c0_1 = arith.constant 0 : index
    %c0_2 = arith.constant 0 : index
    %1 = vector.load %arg2[%c0_1, %c0_2] : memref<16x128xf32, #tpu.memory_space<vmem>>, vector<16x128xf32>
    %cst = arith.constant dense<0.000000e+00> : vector<8x128xf32>
    %2 = tpu.matmul %0, %1, %cst {dimension_numbers = #tpu.dot_dimension_numbers<[1], [0], [0], [1], [0, 0, 1, 1], [], []>} : vector<8x16xf32>, vector<16x128xf32>, vector<8x128xf32> -> vector<8x128xf32>
    %cst_3 = arith.constant 0.000000e+00 : f32
    %3 = vector.broadcast %cst_3 : f32 to vector<8x128xf32>
    %4 = arith.maximumf %2, %3 : vector<8x128xf32>
    %c0_4 = arith.constant 0 : index
    %c0_5 = arith.constant 0 : index
    %5 = vector.load %arg3[%c0_4, %c0_5] : memref<128x128xf32, #tpu.memory_space<vmem>>, vector<128x128xf32>
    %cst_6 = arith.constant dense<0.000000e+00> : vector<8x128xf32>
    %6 = tpu.matmul %4, %5, %cst_6 {dimension_numbers = #tpu.dot_dimension_numbers<[1], [0], [0], [1], [0, 0, 1, 1], [], []>} : vector<8x128xf32>, vector<128x128xf32>, vector<8x128xf32> -> vector<8x128xf32>
    %cst_7 = arith.constant 0.000000e+00 : f32
    %7 = vector.broadcast %cst_7 : f32 to vector<8x128xf32>
    %8 = arith.maximumf %6, %7 : vector<8x128xf32>
    %c0_8 = arith.constant 0 : index
    %c0_9 = arith.constant 0 : index
    %9 = vector.load %arg4[%c0_8, %c0_9] : memref<128x32xf32, #tpu.memory_space<vmem>>, vector<128x32xf32>
    %cst_10 = arith.constant dense<0.000000e+00> : vector<8x32xf32>
    %10 = tpu.matmul %8, %9, %cst_10 {dimension_numbers = #tpu.dot_dimension_numbers<[1], [0], [0], [1], [0, 0, 1, 1], [], []>} : vector<8x128xf32>, vector<128x32xf32>, vector<8x32xf32> -> vector<8x32xf32>
    %c0_11 = arith.constant 0 : index
    %c0_12 = arith.constant 0 : index
    %11 = vector.load %arg9[%c0_11, %c0_12] : memref<8x32xf32, #tpu.memory_space<vmem>>, vector<8x32xf32>
    tpu.vector_store %arg9[%c0_11, %c0_12], %10 {strides = array<i32>} : memref<8x32xf32, #tpu.memory_space<vmem>>, vector<8x32xf32>,
    %cst_13 = arith.constant 0.000000e+00 : f32
    %12 = vector.broadcast %cst_13 : f32 to vector<8x32xf32>
    %13 = arith.maximumf %10, %12 : vector<8x32xf32>
    %c0_14 = arith.constant 0 : index
    %c0_15 = arith.constant 0 : index
    %14 = vector.load %arg5[%c0_14, %c0_15] : memref<32x128xf32, #tpu.memory_space<vmem>>, vector<32x128xf32>
    %cst_16 = arith.constant dense<0.000000e+00> : vector<8x128xf32>
    %15 = tpu.matmul %13, %14, %cst_16 {dimension_numbers = #tpu.dot_dimension_numbers<[1], [0], [0], [1], [0, 0, 1, 1], [], []>} : vector<8x32xf32>, vector<32x128xf32>, vector<8x128xf32> -> vector<8x128xf32>
    %c0_17 = arith.constant 0 : index
    %c0_18 = arith.constant 0 : index
    %16 = vector.load %arg6[%c0_17, %c0_18] : memref<1x128xf32, #tpu.memory_space<vmem>>, vector<1x128xf32>
    %17 = vector.broadcast %16 : vector<1x128xf32> to vector<8x128xf32>
    %18 = arith.addf %15, %17 : vector<8x128xf32>
    %cst_19 = arith.constant 0.000000e+00 : f32
    %19 = vector.broadcast %cst_19 : f32 to vector<8x128xf32>
    %20 = arith.maximumf %18, %19 : vector<8x128xf32>
    %c0_20 = arith.constant 0 : index
    %c0_21 = arith.constant 0 : index
    %21 = vector.load %arg7[%c0_20, %c0_21] : memref<128x16xf32, #tpu.memory_space<vmem>>, vector<128x16xf32>
    %cst_22 = arith.constant dense<0.000000e+00> : vector<8x16xf32>
    %22 = tpu.matmul %20, %21, %cst_22 {dimension_numbers = #tpu.dot_dimension_numbers<[1], [0], [0], [1], [0, 0, 1, 1], [], []>} : vector<8x128xf32>, vector<128x16xf32>, vector<8x16xf32> -> vector<8x16xf32>
    %c0_23 = arith.constant 0 : index
    %c0_24 = arith.constant 0 : index
    %23 = vector.load %arg8[%c0_23, %c0_24] : memref<1x16xf32, #tpu.memory_space<vmem>>, vector<1x16xf32>
    %24 = vector.broadcast %23 : vector<1x16xf32> to vector<8x16xf32>
    %25 = arith.addf %22, %24 : vector<8x16xf32>
    %c0_25 = arith.constant 0 : index
    %c0_26 = arith.constant 0 : index
    %26 = vector.load %arg10[%c0_25, %c0_26] : memref<8x16xf32, #tpu.memory_space<vmem>>, vector<8x16xf32>
    tpu.vector_store %arg10[%c0_25, %c0_26], %25 {strides = array<i32>} : memref<8x16xf32, #tpu.memory_space<vmem>>, vector<8x16xf32>,
    return
  }
  func.func @transform_0(%arg0: i32) -> (i32, i32) {
    %c0_i32 = arith.constant 0 : i32
    %c0_i32_0 = arith.constant 0 : i32
    return %arg0, %c0_i32 : i32, i32
  }
  func.func @transform_1(%arg0: i32) -> (i32, i32) {
    %c0_i32 = arith.constant 0 : i32
    %c0_i32_0 = arith.constant 0 : i32
    %c0_i32_1 = arith.constant 0 : i32
    return %c0_i32, %c0_i32_0 : i32, i32
  }
  func.func @transform_2(%arg0: i32) -> (i32, i32) {
    %c0_i32 = arith.constant 0 : i32
    %c0_i32_0 = arith.constant 0 : i32
    %c0_i32_1 = arith.constant 0 : i32
    return %c0_i32, %c0_i32_0 : i32, i32
  }
  func.func @transform_3(%arg0: i32) -> (i32, i32) {
    %c0_i32 = arith.constant 0 : i32
    %c0_i32_0 = arith.constant 0 : i32
    %c0_i32_1 = arith.constant 0 : i32
    return %c0_i32, %c0_i32_0 : i32, i32
  }
  func.func @transform_4(%arg0: i32) -> (i32, i32) {
    %c0_i32 = arith.constant 0 : i32
    %c0_i32_0 = arith.constant 0 : i32
    %c0_i32_1 = arith.constant 0 : i32
    return %c0_i32, %c0_i32_0 : i32, i32
  }
  func.func @transform_5(%arg0: i32) -> (i32, i32) {
    %c0_i32 = arith.constant 0 : i32
    %c0_i32_0 = arith.constant 0 : i32
    %c0_i32_1 = arith.constant 0 : i32
    return %c0_i32, %c0_i32_0 : i32, i32
  }
  func.func @transform_6(%arg0: i32) -> (i32, i32) {
    %c0_i32 = arith.constant 0 : i32
    %c0_i32_0 = arith.constant 0 : i32
    %c0_i32_1 = arith.constant 0 : i32
    return %c0_i32, %c0_i32_0 : i32, i32
  }
  func.func @transform_7(%arg0: i32) -> (i32, i32) {
    %c0_i32 = arith.constant 0 : i32
    %c0_i32_0 = arith.constant 0 : i32
    %c0_i32_1 = arith.constant 0 : i32
    return %c0_i32, %c0_i32_0 : i32, i32
  }
  func.func @transform_8(%arg0: i32) -> (i32, i32) {
    %c0_i32 = arith.constant 0 : i32
    %c0_i32_0 = arith.constant 0 : i32
    return %arg0, %c0_i32 : i32, i32
  }
  func.func @transform_9(%arg0: i32) -> (i32, i32) {
    %c0_i32 = arith.constant 0 : i32
    %c0_i32_0 = arith.constant 0 : i32
    return %arg0, %c0_i32 : i32, i32
  }
}

</mosaic_0001>

<bundles_post_ra>
// kernel: svdd_forward.1
= control target key start
LH: loop header
LB: loop body
LE: loop exit
PB: predicated region body
PF: predicated region fallthrough
CT: control target
= control target key end

     0   :  { %15 = vsyncpa [#allocation3], 0  ;;  %vm36_vm0 = vcmask 130048   ;;  %s531_s0 = inlined_call_operand.vmem [shape: f32[8,16], index: 0, kind: input, shape index: {}]   ;;  %s532_s1 = inlined_call_operand.vmem [shape: f32[16,128], index: 1, kind: input, shape index: {}]   ;;  %s533_s2 = inlined_call_operand.vmem [shape: f32[128,128], index: 2, kind: input, shape index: {}]   ;;  %s534_s3 = inlined_call_operand.vmem [shape: f32[128,32], index: 3, kind: input, shape index: {}]   ;;  %s535_s4 = inlined_call_operand.vmem [shape: f32[32,128], index: 4, kind: input, shape index: {}]   ;;  %s536_s5 = inlined_call_operand.vmem [shape: f32[1,128], index: 5, kind: input, shape index: {}]   ;;  %s537_s6 = inlined_call_operand.vmem [shape: f32[128,16], index: 6, kind: input, shape index: {}]   ;;  %s538_s7 = inlined_call_operand.vmem [shape: f32[1,16], index: 7, kind: input, shape index: {}]   ;;  %s539_s8 = inlined_call_operand.hbm [shape: f32[8,32], index: 8, kind: output, shape index: {0}]   ;;  %s540_s9 = inlined_call_operand.hbm [shape: f32[8,16], index: 9, kind: output, shape index: {1}]  }
   0x1   :  { %v35_v0 = vld [vmem:[%s532_s1 + $0x8] sm:$0xff]  ;;  %v34_v1 = vld [vmem:[%s532_s1] sm:$0xff]  ;;  %v76_v3 = vld [vmem:[%s533_s2 + $0x78] sm:$0xff] }
   0x2   :  { %54 = vmatpush.msra.mxu3 %v35_v0  ;;  %v33_v2 = vld [vmem:[%s531_s0] sm:$0xff]  ;;  %v75_v4 = vld [vmem:[%s533_s2 + $0x70] sm:$0xff]  ;;  %77 = vmatpush.msra.mxu1 %v76_v3  ;;  %v74_v5 = vld [vmem:[%s533_s2 + $0x68] sm:$0xff] }
   0x3   :  { %v73_v6 = vld [vmem:[%s533_s2 + $0x60] sm:$0xff] }
   0x4   :  { %55 = vmatpush.msra.mxu3 %v34_v1  ;;  %78 = vmatpush.msra.mxu1 %v75_v4 }
   0x5   :  { %242 = vmatmul.msk.f32.vlgmr.msra.gmra.mxu3 %vm36_vm0, %v33_v2 }
   0x6   :  { %79 = vmatpush.msra.mxu1 %v74_v5 }
   0x7   :  { %16 = vsyncpa [#allocation5], 0  ;;  %v72_v7 = vld [vmem:[%s533_s2 + $0x58] sm:$0xff]  ;;  %v71_v8 = vld [vmem:[%s533_s2 + $0x50] sm:$0xff]  ;;  %vm134_vm1 = vcmask 261120   ;;  %s217_s24 = sshll.u32 %s539_s8, 4  ;;  %s218_s24 = int_to_ptr.hbm [resolvable:$true] %s217_s24 }
   0x8   :  { %80 = vmatpush.msra.mxu1 %v73_v6  ;;  %v70_v9 = vld [vmem:[%s533_s2 + $0x48] sm:$0xff]  ;;  %v69_v10 = vld [vmem:[%s533_s2 + $0x40] sm:$0xff]  ;;  %v68_v11 = vld [vmem:[%s533_s2 + $0x38] sm:$0xff]  ;;  %s301_s26 = smov [#allocation4]   ;;  %s228_s29 = sshll.u32 %s540_s9, 4  ;;  %s229_s29 = int_to_ptr.hbm [resolvable:$true] %s228_s29 }
   0x9   :  { %v67_v12 = vld [vmem:[%s533_s2 + $0x30] sm:$0xff]  ;;  %v66_v13 = vld [vmem:[%s533_s2 + $0x28] sm:$0xff]  ;;  %v65_v14 = vld [vmem:[%s533_s2 + $0x20] sm:$0xff]  ;;  %s226_s27 = sshll.u32 %s301_s26, 4  ;;  %s227_s27 = int_to_ptr.vmem [resolvable:$true] %s226_s27 }
   0xa   :  { %81 = vmatpush.msra.mxu1 %v72_v7  ;;  %v64_v15 = vld [vmem:[%s533_s2 + $0x18] sm:$0xff]  ;;  %v63_v16 = vld [vmem:[%s533_s2 + $0x10] sm:$0xff]  ;;  %v62_v17 = vld [vmem:[%s533_s2 + $0x8] sm:$0xff] }
   0xb   :  { %v61_v18 = vld [vmem:[%s533_s2] sm:$0xff]  ;;  %v113_v19 = vld [vmem:[%s534_s3 + $0x78] sm:$0xff]  ;;  %v112_v20 = vld [vmem:[%s534_s3 + $0x70] sm:$0xff] }
   0xc   :  { %82 = vmatpush.msra.mxu1 %v71_v8  ;;  %114 = vmatpush.msra.mxu2 %v113_v19  ;;  %v111_v21 = vld [vmem:[%s534_s3 + $0x68] sm:$0xff]  ;;  %v110_v22 = vld [vmem:[%s534_s3 + $0x60] sm:$0xff]  ;;  %v109_v23 = vld [vmem:[%s534_s3 + $0x58] sm:$0xff] }
   0xd   :  { %v108_v24 = vld [vmem:[%s534_s3 + $0x50] sm:$0xff]  ;;  %v107_v25 = vld [vmem:[%s534_s3 + $0x48] sm:$0xff]  ;;  %v106_v26 = vld [vmem:[%s534_s3 + $0x40] sm:$0xff] }
   0xe   :  { %83 = vmatpush.msra.mxu1 %v70_v9  ;;  %115 = vmatpush.msra.mxu2 %v112_v20  ;;  %v105_v27 = vld [vmem:[%s534_s3 + $0x38] sm:$0xff]  ;;  %v104_v28 = vld [vmem:[%s534_s3 + $0x30] sm:$0xff]  ;;  %v103_v29 = vld [vmem:[%s534_s3 + $0x28] sm:$0xff] }
   0xf   :  { %v102_v30 = vld [vmem:[%s534_s3 + $0x20] sm:$0xff]  ;;  %v101_v31 = vld [vmem:[%s534_s3 + $0x18] sm:$0xff]  ;;  %v100_v32 = vld [vmem:[%s534_s3 + $0x10] sm:$0xff] }
  0x10   :  { %84 = vmatpush.msra.mxu1 %v69_v10  ;;  %116 = vmatpush.msra.mxu2 %v111_v21  ;;  %v99_v35 = vld [vmem:[%s534_s3 + $0x8] sm:$0xff]  ;;  %v98_v36 = vld [vmem:[%s534_s3] sm:$0xff]  ;;  %v140_v37 = vld [vmem:[%s535_s4 + $0x18] sm:$0xff] }
  0x11   :  { %v139_v38 = vld [vmem:[%s535_s4 + $0x10] sm:$0xff]  ;;  %160 = vmatpush.msrb.mxu3 %v140_v37  ;;  %v138_v39 = vld [vmem:[%s535_s4 + $0x8] sm:$0xff]  ;;  %v137_v42 = vld [vmem:[%s535_s4] sm:$0xff]  ;;  %s300_s4 = smov [#allocation2]  }
  0x12   :  { %85 = vmatpush.msra.mxu1 %v68_v11  ;;  %117 = vmatpush.msra.mxu2 %v110_v22  ;;  %v184_v43 = vld [vmem:[%s537_s6 + $0x78] sm:$0xff]  ;;  %v183_v44 = vld [vmem:[%s537_s6 + $0x70] sm:$0xff]  ;;  %v182_v45 = vld [vmem:[%s537_s6 + $0x68] sm:$0xff]  ;;  %s215_s21 = sshll.u32 %s300_s4, 4  ;;  %s216_s21 = int_to_ptr.vmem [resolvable:$true] %s215_s21 }
  0x13   :  { %161 = vmatpush.msrb.mxu3 %v139_v38  ;;  %189 = vmatpush.msra.mxu0 %v184_v43  ;;  %v181_v46 = vld [vmem:[%s537_s6 + $0x60] sm:$0xff]  ;;  %v180_v47 = vld [vmem:[%s537_s6 + $0x58] sm:$0xff]  ;;  %v179_v48 = vld [vmem:[%s537_s6 + $0x50] sm:$0xff] }
  0x14   :  { %86 = vmatpush.msra.mxu1 %v67_v12  ;;  %118 = vmatpush.msra.mxu2 %v109_v23  ;;  %v178_v49 = vld [vmem:[%s537_s6 + $0x48] sm:$0xff]  ;;  %v177_v50 = vld [vmem:[%s537_s6 + $0x40] sm:$0xff]  ;;  %v176_v51 = vld [vmem:[%s537_s6 + $0x38] sm:$0xff] }
  0x15   :  { %162 = vmatpush.msrb.mxu3 %v138_v39  ;;  %190 = vmatpush.msra.mxu0 %v183_v44  ;;  %v175_v52 = vld [vmem:[%s537_s6 + $0x30] sm:$0xff]  ;;  %v174_v53 = vld [vmem:[%s537_s6 + $0x28] sm:$0xff]  ;;  %v173_v54 = vld [vmem:[%s537_s6 + $0x20] sm:$0xff] }
  0x16   :  { %87 = vmatpush.msra.mxu1 %v66_v13  ;;  %119 = vmatpush.msra.mxu2 %v108_v24  ;;  %v172_v55 = vld [vmem:[%s537_s6 + $0x18] sm:$0xff]  ;;  %v171_v58 = vld [vmem:[%s537_s6 + $0x10] sm:$0xff]  ;;  %v170_v59 = vld [vmem:[%s537_s6 + $0x8] sm:$0xff] }
  0x17   :  { %163 = vmatpush.msrb.mxu3 %v137_v42  ;;  %191 = vmatpush.msra.mxu0 %v182_v45  ;;  %v169_v60 = vld [vmem:[%s537_s6] sm:$0xff] }
  0x18   :  { %88 = vmatpush.msra.mxu1 %v65_v14  ;;  %120 = vmatpush.msra.mxu2 %v107_v25  ;;  %v246_v61 = vld [vmem:[%s536_s5] ss:$0 sm:$0xff] }
  0x19   :  { %192 = vmatpush.msra.mxu0 %v181_v46  ;;  %v247_v1 = vld [vmem:[%s538_s7] ss:$0 sm:$0xff] }
  0x1a   :  { %89 = vmatpush.msra.mxu1 %v64_v15  ;;  %121 = vmatpush.msra.mxu2 %v106_v26 }
  0x1b   :  { %193 = vmatpush.msra.mxu0 %v180_v47 }
  0x1c   :  { %90 = vmatpush.msra.mxu1 %v63_v16  ;;  %122 = vmatpush.msra.mxu2 %v105_v27 }
  0x1d   :  { %194 = vmatpush.msra.mxu0 %v179_v48 }
  0x1e   :  { %91 = vmatpush.msra.mxu1 %v62_v17  ;;  %123 = vmatpush.msra.mxu2 %v104_v28 }
  0x1f   :  { %195 = vmatpush.msra.mxu0 %v178_v49 }
  0x20   :  { %92 = vmatpush.msra.mxu1 %v61_v18  ;;  %124 = vmatpush.msra.mxu2 %v103_v29 }
  0x21   :  { %196 = vmatpush.msra.mxu0 %v177_v50 }
  0x22   :  { %125 = vmatpush.msra.mxu2 %v102_v30 }
  0x23   :  { %197 = vmatpush.msra.mxu0 %v176_v51 }
  0x24   :  { %126 = vmatpush.msra.mxu2 %v101_v31 }
  0x25   :  { %198 = vmatpush.msra.mxu0 %v175_v52 }
  0x26   :  { %127 = vmatpush.msra.mxu2 %v100_v32 }
  0x27   :  { %199 = vmatpush.msra.mxu0 %v174_v53 }
  0x28   :  { %128 = vmatpush.msra.mxu2 %v99_v35 }
  0x29   :  { %200 = vmatpush.msra.mxu0 %v173_v54 }
  0x2a   :  { %129 = vmatpush.msra.mxu2 %v98_v36 }
  0x2b   :  { %201 = vmatpush.msra.mxu0 %v172_v55 }
  0x2d   :  { %202 = vmatpush.msra.mxu0 %v171_v58 }
  0x2f   :  { %203 = vmatpush.msra.mxu0 %v170_v59 }
  0x31   :  { %204 = vmatpush.msra.mxu0 %v169_v60 }
  0x88   :  { %v57_v33 = vpop.f32.mrf.mxu3 }
  0x89   :  { %v60_v34 = vmax.f32 %v57_v33, 0.0 }
  0x8b   :  { %93 = vmatmul.f32.vlgmr.msra.gmra.mxu1 %v60_v34 }
 0x108   :  { %v94_v40 = vpop.f32.mrf.mxu1 }
 0x109   :  { %v97_v41 = vmax.f32 %v94_v40, 0.0 }
 0x10b   :  { %130 = vmatmul.f32.vlgmr.msra.gmra.mxu2 %v97_v41 }
 0x18e   :  { %v131_v56 = vpop.f32.mrf.mxu2 }
 0x18f   :  { %135 = vst.msk [vmem:[#allocation2] sm:$0xff] %vm134_vm1, %v131_v56  ;;  %v136_v57 = vmax.f32 %v131_v56, 0.0 }
 0x190   :  { %220 = dma.vmem_to_hbm [thread:$0]  %s216_s21, 128, %s218_s24, [#allocation3]  }
 0x191   :  { %243 = vmatmul.msk.f32.vlgmr.msrb.gmra.mxu3 %vm134_vm1, %v136_v57 }
 0x214   :  { %v165_v62 = vpop.f32.mrf.mxu3 }
 0x215   :  { %v166_v63 = vadd.f32 %v246_v61, %v165_v62 }
 0x217   :  { %v168_v0 = vmax.f32 %v166_v63, 0.0 }
 0x219   :  { %205 = vmatmul.f32.vlgmr.msra.gmra.mxu0 %v168_v0 }
 0x296   :  { %v206_v2 = vpop.f32.mrf.mxu0 }
 0x297   :  { %v207_v3 = vadd.f32 %v247_v1, %v206_v2 }
 0x299   :  { %209 = vst.msk [vmem:[#allocation4] sm:$0xff] %vm36_vm0, %v207_v3 }
 0x29a   :  { %231 = dma.vmem_to_hbm [thread:$0]  %s227_s27, 128, %s229_s29, [#allocation5]  }
 0x29b   :  { %296 = dma.done.wait [#allocation3], 128  }
 0x29c   :  { %297 = vsyncadd [#allocation3], 4294967168 }
 0x29d   :  { %298 = dma.done.wait [#allocation5], 128  }
 0x29e   :  { %299 = vsyncadd [#allocation5], 4294967168 }
 0x29f   :  { %240 = vsyncpa [#allocation3], 1 }
 0x2a0   :  { %241 = vsyncpa [#allocation5], 1 }

</bundles_post_ra>
